<compile_context>
chip_gen: v5e
topology: v5e:2x2
jax: 0.10.0
libtpu: 0.0.40
codegen_flags: <defaults>
</compile_context>

<pallas_src>
import jax
import jax.numpy as jnp
from jax.experimental import pallas as pl
from jax.experimental.pallas import tpu as pltpu

_LANE = 128


def _make_kernel(precision):
    def kernel(w_ref, x_ref, o_ref):
        # w_ref: (C_out, C_in) VMEM-resident weight.
        # x_ref: (bn, C_in, tn) pixel tile in native NCHW layout (lanes = pixels).
        # out[b, o, p] = sum_c W[o, c] * x[b, c, p]  -> lane-dense (bn, C_out, tn).
        w = w_ref[...]
        # bn is a static block dim (<= 16), so this Python loop fully unrolls.
        for b in range(x_ref.shape[0]):
            o_ref[b] = jnp.dot(
                w,
                x_ref[b],
                precision=precision,
                preferred_element_type=jnp.float32,
            ).astype(o_ref.dtype)

    return kernel


def _vmem_capacity_bytes():
    """Physical VMEM per TensorCore; conservative fallback (v7x-sized) if unknown."""
    try:
        info = pltpu.get_tpu_info()
        for attr in ("vmem_capacity_bytes", "vmem_bytes", "vmem_size_bytes"):
            v = getattr(info, attr, None)
            if v:
                return int(v)
    except Exception:
        pass
    return 64 << 20  # assume the smallest generation (v7x) when the query fails


def _pick_tiles(n, hw, c_pad, itemsize, *, max_tile, buf_budget,
                min_steps=8, max_bn=16):
    """Pick (bn, tn): batch-block and pixel-block sizes.

    buf_budget bounds ~2x(in + out) double-buffered blocks; c_pad is the
    channel count rounded up to a full sublane so the estimate matches what
    VMEM actually allocates.
    """
    if hw < _LANE:
        # Small-spatial / large-channel stages: take the whole pixel axis and
        # fold batch into the block to amortize per-step overhead.
        per_batch = max(1, c_pad * hw * itemsize)
        bn = max(1, min(n, max_bn,
                        (1 << 20) // per_batch,
                        buf_budget // (4 * per_batch)))
        # Still keep several grid steps when the batch is big enough so the
        # pipeline can overlap DMAs and megacore has work to split.
        while bn > 1 and pl.cdiv(n, bn) < min(min_steps, n):
            bn = max(1, bn // 2)
        return bn, hw

    # Large-spatial path: bn = 1, pick the widest lane-aligned pixel tile that
    # fits the (sublane-padded, double-buffered) VMEM budget.
    cap = buf_budget // (4 * c_pad * itemsize)
    tn = min(max_tile, cap, hw)
    tn = max(_LANE, (tn // _LANE) * _LANE)
    # Guarantee multiple grid steps (>= ~2x num_cores, target 8) whenever the
    # pixel axis is splittable on 128-lane boundaries.
    while tn > _LANE and n * pl.cdiv(hw, tn) < min_steps:
        tn = max(_LANE, ((tn // 2) // _LANE) * _LANE)
    return 1, tn


def invconv2d_forward(x_nchw, weight, *, hbm_dtype=None, max_tile=65536):
    """Forward pass of InvConv2d.

    x_nchw: (N, C, H, W); weight: (C_out, C_in) so that
      out[n, o, h, w] = sum_c weight[o, c] * x[n, c, h, w]

    hbm_dtype: optional reduced-precision HBM residency (e.g. jnp.bfloat16);
    accumulation stays f32 and the output keeps x's dtype.
    """
    N, C, H, W = x_nchw.shape
    Cout, Cin = weight.shape
    assert Cin == C, "weight must contract against the channel axis"
    HW = H * W
    out_dtype = x_nchw.dtype

    # Contiguous view only -- no transpose, no extra HBM traffic.
    x3 = x_nchw.reshape(N, C, HW)
    if hbm_dtype is not None and jnp.dtype(hbm_dtype) != jnp.dtype(out_dtype):
        x3 = x3.astype(hbm_dtype)
        weight = weight.astype(hbm_dtype)

    compute_dtype = jnp.dtype(x3.dtype)
    itemsize = compute_dtype.itemsize
    sublane = max(1, 32 // itemsize)                       # 8 (f32) / 16 (bf16)
    c_pad = ((max(C, Cout) + sublane - 1) // sublane) * sublane

    # Generation-aware VMEM sizing: v5e/v6e (128 MiB) -> 96 MiB limit,
    # v7x (64 MiB) -> 48 MiB limit; buffers get ~3/4 of the limit.
    vmem_phys = _vmem_capacity_bytes()
    vmem_limit = min(96 << 20, (vmem_phys * 3) // 4)
    buf_budget = (vmem_limit * 3) // 4

    bn, tn = _pick_tiles(N, HW, c_pad, itemsize,
                         max_tile=max_tile, buf_budget=buf_budget)
    grid = (pl.cdiv(N, bn), pl.cdiv(HW, tn))

    precision = (jax.lax.Precision.HIGHEST
                 if compute_dtype == jnp.dtype(jnp.float32) else None)

    out3 = pl.pallas_call(
        _make_kernel(precision),
        out_shape=jax.ShapeDtypeStruct((N, Cout, HW), out_dtype),
        grid_spec=pltpu.PrefetchScalarGridSpec(
            num_scalar_prefetch=0,
            grid=grid,
            in_specs=[
                # Same block every step -> weight stays resident in VMEM.
                pl.BlockSpec((Cout, Cin), lambda n, p: (0, 0)),
                # Lane-dense pixel tile straight out of NCHW memory.
                pl.BlockSpec((bn, C, tn), lambda n, p: (n, 0, p)),
            ],
            out_specs=pl.BlockSpec((bn, Cout, tn), lambda n, p: (n, 0, p)),
        ),
        compiler_params=pltpu.CompilerParams(
            # Megacore sharding is free load-balancing here (HBM-bound), but
            # both axes are independent so mark them parallel anyway.
            dimension_semantics=("parallel", "parallel"),
            vmem_limit_bytes=vmem_limit,
        ),
    )(weight, x3)

    return out3.reshape(N, Cout, H, W)


def make_invconv_weight(in_channel, key):
    """Deterministic stand-in for torch.randn + torch.qr: random orthogonal C x C."""
    w = jax.random.normal(key, (in_channel, in_channel), dtype=jnp.float32)
    q, _ = jnp.linalg.qr(w)
    return q


if __name__ == "__main__":
    key = jax.random.PRNGKey(0)
    k_w, k_x, k_w2, k_x2 = jax.random.split(key, 4)

    # Case 1: typical early Glow stage (larger spatial, small C) -> pixel-tiled path.
    N, C, H, W = 2, 4, 16, 16
    weight = make_invconv_weight(C, k_w)                      # (C, C) orthogonal
    x = jax.random.normal(k_x, (N, C, H, W), dtype=jnp.float32)
    out = jax.block_until_ready(invconv2d_forward(x, weight))
    ref = jnp.einsum("oc,nchw->nohw", weight, x,
                     precision=jax.lax.Precision.HIGHEST)
    assert out.shape == (N, C, H, W)
    assert jnp.allclose(out, ref, atol=1e-5, rtol=1e-5)

    # Case 2: small-spatial / larger-C stage (HW < 128) -> batched-block path.
    N2, C2, H2, W2 = 4, 8, 8, 8
    weight2 = make_invconv_weight(C2, k_w2)
    x2 = jax.random.normal(k_x2, (N2, C2, H2, W2), dtype=jnp.float32)
    out2 = jax.block_until_ready(invconv2d_forward(x2, weight2))
    ref2 = jnp.einsum("oc,nchw->nohw", weight2, x2,
                      precision=jax.lax.Precision.HIGHEST)
    assert out2.shape == (N2, C2, H2, W2)
    assert jnp.allclose(out2, ref2, atol=1e-5, rtol=1e-5)

    print("KERNEL_OK")
</pallas_src>

<mosaic_0001>
module attributes {stable_mosaic.version = 11 : i64} {
  func.func @kernel(%arg0: i32, %arg1: i32, %arg2: memref<4x4xf32, #tpu.memory_space<vmem>>, %arg3: memref<1x4x128xf32, #tpu.memory_space<vmem>>, %arg4: memref<1x4x128xf32, #tpu.memory_space<vmem>>) attributes {dimension_semantics = [#tpu.dimension_semantics<parallel>, #tpu.dimension_semantics<parallel>], iteration_bounds = array<i64: 2, 2>, scalar_prefetch = 0 : i64, scratch_operands = 0 : i64, tpu.core_type = #tpu.core_type<tc>, window_params = [{pipeline_mode = #tpu.pipeline_mode<synchronous>, transform_indices = @transform_0, window_bounds = array<i64: 4, 4>}, {transform_indices = @transform_1, window_bounds = array<i64: 1, 4, 128>}, {transform_indices = @transform_2, window_bounds = array<i64: 1, 4, 128>}]} {
    %c0 = arith.constant 0 : index
    %c0_0 = arith.constant 0 : index
    %0 = vector.load %arg2[%c0, %c0_0] : memref<4x4xf32, #tpu.memory_space<vmem>>, vector<4x4xf32>
    %c0_1 = arith.constant 0 : index
    %c0_2 = arith.constant 0 : index
    %c0_3 = arith.constant 0 : index
    %1 = vector.load %arg3[%c0_1, %c0_2, %c0_3] : memref<1x4x128xf32, #tpu.memory_space<vmem>>, vector<1x4x128xf32>
    %2 = vector.shape_cast %1 : vector<1x4x128xf32> to vector<4x128xf32>
    %cst = arith.constant dense<0.000000e+00> : vector<4x128xf32>
    %3 = tpu.matmul %0, %2, %cst {dimension_numbers = #tpu.dot_dimension_numbers<[1], [0], [0], [1], [0, 0, 1, 1], [], []>, precision = #tpu.contract_precision<fp32>} : vector<4x4xf32>, vector<4x128xf32>, vector<4x128xf32> -> vector<4x128xf32>
    %c0_4 = arith.constant 0 : index
    %c0_5 = arith.constant 0 : index
    %c0_6 = arith.constant 0 : index
    %4 = vector.load %arg4[%c0_4, %c0_5, %c0_6] : memref<1x4x128xf32, #tpu.memory_space<vmem>>, vector<1x4x128xf32>
    %5 = vector.shape_cast %4 : vector<1x4x128xf32> to vector<4x128xf32>
    %6 = vector.shape_cast %3 : vector<4x128xf32> to vector<1x4x128xf32>
    tpu.vector_store %arg4[%c0_4, %c0_5, %c0_6], %6 {strides = array<i32>} : memref<1x4x128xf32, #tpu.memory_space<vmem>>, vector<1x4x128xf32>,
    return
  }
  func.func @transform_0(%arg0: i32, %arg1: i32) -> (i32, i32) {
    %c0_i32 = arith.constant 0 : i32
    %c0_i32_0 = arith.constant 0 : i32
    %c0_i32_1 = arith.constant 0 : i32
    return %c0_i32, %c0_i32_0 : i32, i32
  }
  func.func @transform_1(%arg0: i32, %arg1: i32) -> (i32, i32, i32) {
    %c0_i32 = arith.constant 0 : i32
    %c0_i32_0 = arith.constant 0 : i32
    return %arg0, %c0_i32, %arg1 : i32, i32, i32
  }
  func.func @transform_2(%arg0: i32, %arg1: i32) -> (i32, i32, i32) {
    %c0_i32 = arith.constant 0 : i32
    %c0_i32_0 = arith.constant 0 : i32
    return %arg0, %c0_i32, %arg1 : i32, i32, i32
  }
}

</mosaic_0001>

<bundles_post_ra>
// kernel: tpu_custom_call.1
= control target key start
LH: loop header
LB: loop body
LE: loop exit
PB: predicated region body
PF: predicated region fallthrough
CT: control target
= control target key end

     0   :  { %s929_s0 = inlined_call_operand.hbm [shape: f32[4,4], index: 0, kind: input, shape index: {}]   ;;  %s930_s1 = inlined_call_operand.hbm [shape: f32[2,4,256], index: 1, kind: input, shape index: {}]   ;;  %s931_s2 = inlined_call_operand.hbm [shape: f32[2,4,256], index: 2, kind: output, shape index: {}]  }
   0x1   :  { %936 = sst [smem:[#allocation15_spill]] %s929_s0 }
   0x2   :  { %7 = vsyncpa [#allocation3], 0 }
   0x3   :  { %8 = vsyncpa [#allocation6], 0 }
   0x4   :  { %10 = vsyncpa [#allocation6 + $0x1], 0 }
   0x5   :  { %11 = vsyncpa [#allocation4], 0 }
   0x6   :  { %13 = vsyncpa [#allocation4 + $0x1], 0  ;;  %s752_s9 = smov 0   ;;  %s754_s10 = smov 0  }
   0x7   :  { %s756_s11 = smov 0   ;;  %s758_s12 = smov 0  }
   0x8   :  { %s760_s13 = smov 0   ;;  %s762_s14 = smov 0  }
   0x9   :  { %s764_s15 = smov 0   ;;  %s766_s16 = smov 0  }
   0xa LB: > { %937 = sst [smem:[#allocation11_spill]] %s706_s9  ;;  %s466_s17 = sadd.s32 4294967295, %s734_s16   ;;  %s734_s16 = sphi %s766_s16, %s19_s16   ;;  %s730_s15 = sphi %s764_s15, %s959_s15   ;;  %s726_s14 = sphi %s762_s14, %s958_s14   ;;  %s722_s13 = sphi %s760_s13, %s957_s13   ;;  %s718_s12 = sphi %s758_s12, %s956_s12   ;;  %s714_s11 = sphi %s756_s11, %s955_s11   ;;  %s710_s10 = sphi %s754_s10, %s954_s10   ;;  %s706_s9 = sphi %s752_s9, %s953_s9  }
   0xb   : > { %s467_s18 = sadd.s32 4294967294, %s734_s16   ;;  %p74_p0 = scmp.ne.s32.totalorder %s710_s10, %s706_s9 }
   0xc   : > { %p796_p1 = scmp.eq.s32.totalorder %s466_s17, 0  ;;  %p800_p2 = scmp.eq.s32.totalorder %s466_s17, 3 }
   0xd   : > { %p106_p3 = scmp.eq.s32.totalorder %s467_s18, 3  ;;  %p468_p5 = scmp.ge.s32.totalorder %s734_s16, 1 }
   0xe   : > { %p806_p4 = por %p796_p1, %p74_p0  ;;  %p113_p7 = scmp.lt.s32.totalorder %s734_s16, 5 }
   0xf   : > { %p811_p6 = por %p106_p3, %p74_p0  ;;  %s943_s0 = sld [smem:[#allocation15_spill]] }
  0x10   : > { %p819_p8 = pnand %p468_p5, %p113_p7  ;;  %s736_s27 = smov [#allocation2]  }
  0x11   : > { %s941_s22 = scalar_select %p811_p6, 1, 0 }
  0x12   : > { %p491_p9 = pneg %p819_p8  ;;  %s127_s28 = sshll.u32 %s736_s27, 4  ;;  %s128_s28 = int_to_ptr.vmem [resolvable:$true] %s127_s28 }
  0x13   : > { %942 = sst [smem:[#allocation12_spill]] %s941_s22  ;;  %s28_s29 = sadd.s32 1, %s726_s14 }
  0x14   : > { %p492_p10 = pnand %p491_p9, %p796_p1  ;;  %p29_p11 = scmp.ge.s32.totalorder %s28_s29, 2 }
  0x15   : > { %s125_s25 = sshll.u32 %s943_s0, 4  ;;  %s31_s30 = sadd.s32 1, %s730_s15  ;;  %s126_s25 = int_to_ptr.hbm [resolvable:$true] %s125_s25 }
  0x16   : > { %494 = dma.hbm_to_vmem [thread:$0]  (!%p492_p10), %s126_s25, 64, %s128_s28, [#allocation3]  }
  0x17   : > { %s61_s3 = sadd.s32 1, %s714_s11  ;;  %p68_p12 = scmp.ne.s32.totalorder %s714_s11, %s710_s10 }
  0x18   : > { %s961_s29 = smov (%p29_p11, %s28_s29), 0  ;;  %s963_s30 = smov (!%p29_p11, %s31_s30), %s730_s15 }
  0x19   : > { %945 = sst [smem:[#allocation13_spill]] %s961_s29  ;;  %s57_s4 = ssub.s32 %s726_s14, %s961_s29 }
  0x1a   : > { %p69_p13 = scmp.eq.s32.totalorder %s734_s16, 0  ;;  %p33_p0 = scmp.ge.s32.totalorder %s963_s30, 2 }
  0x1b   : > { %p840_p3 = por %p800_p2, %p68_p12  ;;  %p504_p7 = scmp.lt.s32.totalorder %s734_s16, 4 }
  0x1c   : > { %p844_p5 = por %p69_p13, %p68_p12  ;;  %s965_s30 = smov (%p33_p0, %s963_s30), 0 }
  0x1d   : > { %948 = sst [smem:[#allocation14_spill]] %s965_s30  ;;  %s138_s7 = sand.u32 1, %s714_s11  }
  0x1e   : > { %s472_s8 = sshll.u32 %s730_s15, 1  ;;  %s56_s17 = ssub.s32 %s730_s15, %s965_s30 }
  0x1f   : > { %s58_s18 = sor.u32 %s57_s4, %s56_s17  ;;  %s471_s23 = sshll.u32 %s138_s7, 2 }
  0x20   : > { %p59_p9 = scmp.eq.s32.totalorder %s58_s18, 0  ;;  %s146_s20 = sadd.s32 %s726_s14, %s472_s8 }
  0x21   : > { %s142_s24 = scalar_lea.vmem [#allocation5], %s471_s23  ;;  %s473_s28 = sshll.u32 %s146_s20, 2 }
  0x22   : > { %s152_s25 = sshll.u32 %s142_s24, 4  ;;  %s148_s22 = scalar_lea.hbm %s930_s1, %s473_s28  ;;  %s153_s25 = int_to_ptr.vmem [resolvable:$true] %s152_s25 }
  0x23   : > { %s857_s27 = scalar_select %p59_p9, %s714_s11, %s61_s3  }
  0x24   : > { %p496_p2 = pnand %p504_p7, %p844_p5  ;;  %s150_s9 = sshll.u32 %s148_s22, 4  ;;  %s151_s9 = int_to_ptr.hbm [resolvable:$true] %s150_s9 }
  0x25   : > { %s139_s30 = scalar_lea.sflag [#allocation6], %s138_s7  ;;  %161 = sbr.rel (%p819_p8) target bundleno = 201 (0xc9), region = 28 }
  0x26   : > { %498 = dma.hbm_to_vmem [thread:$0]  (!%p496_p2), %s151_s9, 64, %s153_s25, %s139_s30  }
  0x2a   : > { %693 = dma.done.wait (%p796_p1), [#allocation3], 64  }
  0x2b   : > { %695 = vsyncadd (%p796_p1), [#allocation3], 4294967232  ;;  %s873_s0 = sand.u32 1, %s710_s10  }
  0x2c   : > { %s476_s22 = sshll.u32 %s873_s0, 2  ;;  %s169_s29 = scalar_lea.sflag [#allocation6], %s873_s0 }
  0x2d   : > { %s172_s9 = scalar_lea.vmem [#allocation5], %s476_s22 }
  0x2e   : > { %697 = dma.done.wait (%p806_p4), %s169_s29, 64  }
  0x2f   : > { %699 = vsyncadd (%p806_p4), %s169_s29, 4294967232  ;;  %vm200_vm0 = vcmask 1043456   ;;  %vm196_vm1 = vcmask 31744   ;;  %v195_v0 = vld [vmem:[%s172_s9] sm:$0xf]  ;;  %s479_s19 = sshll.u32 %s722_s13, 1 }
  0x30   : > { %v194_v1 = vld [vmem:[#allocation2] sm:$0xf]  ;;  %v202_v2 = vsel %vm200_vm0, %v195_v0, 0  ;;  %s362_s21 = sadd.s32 %s718_s12, %s479_s19  ;;  %s193_s6 = scalar_lea.vmem [#allocation7], %s476_s22 }
  0x31   : > { %v198_v3 = vsel %vm196_vm1, %v194_v1, 0  ;;  %v219_v4 = vand.u32 4294901760, %v202_v2  ;;  %s480_s26 = sshll.u32 %s362_s21, 2  ;;  %s366_s7 = sshll.u32 %s193_s6, 4  ;;  %s367_s7 = int_to_ptr.vmem [resolvable:$true] %s366_s7 }
  0x32   : > { %v221_v5 = vand.u32 4294901760, %v198_v3  ;;  %s364_s4 = scalar_lea.hbm %s931_s2, %s480_s26  ;;  %s352_s12 = scalar_lea.sflag [#allocation4], %s873_s0 }
  0x33   : > { %v246_v6 = vsub.f32 %v202_v2, %v219_v4  ;;  %296 = vmatpush.msra.mxu3 %v219_v4  ;;  %220 = vmatpush.msra.mxu0 %v219_v4  ;;  %s368_s13 = sshll.u32 %s364_s4, 4  ;;  %s652_s20 = scalar_lea.hbm %s931_s2, 16  ;;  %s369_s13 = int_to_ptr.hbm [resolvable:$true] %s368_s13 }
  0x34   : > { %v222_v7 = vsub.f32 %v198_v3, %v221_v5  ;;  %s646_s8 = sshra.s32 %s369_s13, 4  ;;  %s647_s8 = int_to_ptr.hbm [resolvable:$true] %s646_s8 }
  0x35   : > { %273 = vmatpush.msra.mxu2 %v246_v6  ;;  %v247_v9 = vand.u32 4294901760, %v246_v6  ;;  %s648_s17 = scalar_lea.hbm %s647_s8, 4  ;;  %p653_p10 = scmp.lt.s32.totalorder %s647_s8, %s931_s2 }
  0x36   : > { %v223_v8 = vand.u32 4294901760, %v222_v7  ;;  %276 = vmatmul.f32.vlgmr.msra.gmra.mxu2 %v222_v7  ;;  %p649_p1 = scmp.ne.s32.totalorder %s647_s8, %s648_s17  ;;  %p654_p11 = scmp.lt.s32.totalorder %s652_s20, %s648_s17 }
  0x37   : > { %v248_v11 = vsub.f32 %v246_v6, %v247_v9  ;;  %322 = vmatpush.msrb.mxu0 %v247_v9 }
  0x38   : > { %300 = vmatmul.f32.vlgmr.msra.gmra.mxu3 %v223_v8  ;;  %v224_v10 = vsub.f32 %v222_v7, %v223_v8  ;;  %p650_p4 = pnand %p649_p1, %p840_p3  ;;  %p655_p12 = por %p654_p11, %p653_p10 }
  0x39   : > { %v249_v13 = vand.u32 4294901760, %v248_v11 }
  0x3a   : > { %v225_v12 = vand.u32 4294901760, %v224_v10  ;;  %p651_p8 = pneg %p650_p4 }
  0x3b   : > { %250 = vmatpush.msra.mxu1 %v249_v13 }
  0x3c   : > { %226 = vmatmul.f32.vlgmr.msra.gmra.mxu0 %v225_v12  ;;  %252 = vmatmul.f32.vlgmr.msra.gmra.mxu1 %v221_v5  ;;  %p656_p13 = pnand %p655_p12, %p651_p8 }
  0x3d   : > { %344 = vmatpush.msrb.mxu1 %v219_v4 }
  0x44   : > { %324 = vmatmul.f32.vlgmr.msrb.gmra.mxu0 %v221_v5  ;;  %346 = vmatmul.f32.vlgmr.msrb.gmra.mxu1 %v221_v5 }
  0xb9   : > { %v227_v14 = vpop.f32.mrf.mxu0  ;;  %v253_v15 = vpop.f32.mrf.mxu1 }
  0xba   : > { %v277_v16 = vpop.f32.mrf.mxu2  ;;  %v254_v17 = vadd.f32 %v253_v15, %v227_v14 }
  0xbb   : > { %v301_v18 = vpop.f32.mrf.mxu3 }
  0xbc   : > { %v278_v19 = vadd.f32 %v277_v16, %v254_v17 }
  0xbe   : > { %v302_v20 = vadd.f32 %v301_v18, %v278_v19 }
  0xc1   : > { %v325_v21 = vpop.f32.mrf.mxu0  ;;  %v347_v23 = vpop.f32.mrf.mxu1 }
  0xc2   : > { %v326_v22 = vadd.f32 %v325_v21, %v302_v20 }
  0xc4   : > { %v348_v24 = vadd.f32 %v347_v23, %v326_v22 }
  0xc6   : > { %350 = vst [vmem:[%s193_s6] sm:$0xf] %v348_v24 }
  0xc7   : > { %659 = shalt.err (!%p656_p13)
}
  0xc8   : > { %489 = dma.vmem_to_hbm [thread:$0]  (%p840_p3), %s367_s7, 64, %s369_s13, %s352_s12  }
  0xc9 PF: > { %s949_s28 = sld [smem:[#allocation11_spill]]  ;;  %p506_p0 = scmp.ge.s32.totalorder %s734_s16, 2 }
  0xcb   : > { %p500_p5 = pnand %p506_p0, %p811_p6 }
  0xcd   : > { %p501_p7 = pneg %p500_p5 }
  0xcf   : > { %s380_s22 = sand.u32 1, %s949_s28  }
  0xd0   : > { %s381_s29 = scalar_lea.sflag [#allocation4], %s380_s22 }
  0xd1   : > { %701 = dma.done.wait (%p501_p7), %s381_s29, 64  }
  0xd2   : > { %703 = vsyncadd (%p501_p7), %s381_s29, 4294967232  ;;  %s19_s16 = sadd.s32 1, %s734_s16   ;;  %s951_s5 = sld [smem:[#allocation13_spill]] }
  0xd3   : > { %p16_p9 = scmp.ge.s32.totalorder %s19_s16, 6   ;;  %s952_s19 = sld [smem:[#allocation14_spill]] }
  0xd4   : > { %s953_s9 = smov %s710_s10  ;;  %s954_s10 = smov %s714_s11 }
  0xd5   : > { %s955_s11 = smov %s857_s27  ;;  %s956_s12 = smov %s726_s14 }
  0xd6   : > { %s957_s13 = smov %s730_s15  ;;  %18 = sbr.rel (!%p16_p9) target bundleno = 10 (0xa), region = 78 }
  0xd8   : > { %s958_s14 = smov %s951_s5 }
  0xd9   : > { %s959_s15 = smov %s952_s19 }
  0xdb   :  { %387 = vsyncpa [#allocation3], 1 }
  0xdc   :  { %389 = vsyncpa [#allocation3 + $0x1], 1 }
  0xdd   :  { %390 = vsyncpa [#allocation6], 1 }
  0xde   :  { %392 = vsyncpa [#allocation6 + $0x1], 1 }
  0xdf   :  { %393 = vsyncpa [#allocation4], 1 }
  0xe0   :  { %395 = vsyncpa [#allocation4 + $0x1], 1 }

</bundles_post_ra>
